<compile_context>
chip_gen: v7x
topology: tpu7x:2x2x1
jax: 0.10.0
libtpu: 0.0.40
codegen_flags: <defaults>
</compile_context>

<pallas_src>
import functools

import jax
import jax.numpy as jnp
from jax import lax
from jax.experimental import pallas as pl
from jax.experimental.pallas import tpu as pltpu

SMOOTH = 0.01
_LANE = 128
# Bytes allowed for the double-buffered input blocks (2 inputs x 2 buffers).
_VMEM_BUDGET_BYTES = 24 * 1024 * 1024
_VMEM_LIMIT_BYTES = 48 * 1024 * 1024   # < v7x 64 MiB physical; explicit on v5e.


def _dice_sums_kernel(x_ref, t_ref, inter_ref, denom_ref, *,
                      d_total, tile_d, mask_cols):
    """Accumulates per-row intersection and (x + t) sums across D-chunks."""
    j = pl.program_id(1)

    @pl.when(j == 0)
    def _():
        inter_ref[...] = jnp.zeros_like(inter_ref)
        denom_ref[...] = jnp.zeros_like(denom_ref)

    # Cast on the loaded tile (VPU has slack); HBM only moved native bytes.
    x = x_ref[...].astype(jnp.float32)   # (bn, tile_d)
    t = t_ref[...].astype(jnp.float32)

    if mask_cols:
        is_last = j == pl.num_programs(1) - 1

        @pl.when(jnp.logical_not(is_last))
        def _():
            # Full chunks: no masking work at all.
            inter_ref[...] += jnp.sum(x * t, axis=1, keepdims=True)
            denom_ref[...] += jnp.sum(x + t, axis=1, keepdims=True)

        @pl.when(is_last)
        def _():
            # Ragged tail chunk only: zero lanes past the true row length so
            # edge-block padding garbage never enters the sums.
            col = j * tile_d + lax.broadcasted_iota(jnp.int32, x.shape, 1)
            valid = col < d_total
            xm = jnp.where(valid, x, 0.0)
            tm = jnp.where(valid, t, 0.0)
            inter_ref[...] += jnp.sum(xm * tm, axis=1, keepdims=True)
            denom_ref[...] += jnp.sum(xm + tm, axis=1, keepdims=True)
    else:
        inter_ref[...] += jnp.sum(x * t, axis=1, keepdims=True)
        denom_ref[...] += jnp.sum(x + t, axis=1, keepdims=True)


def _row_split(n, d, sublane):
    """Pick R for the free reshape (n, d) -> (n*R, d//R).

    Goal: n*R >= 2*sublane so (a) every vreg carries full sublanes even for
    tiny batches and (b) the "parallel" batch-block grid axis has extent >= 2
    (both v7x TensorCores get work).  R must divide d exactly (pure reshape,
    no copy) and keep rows at least one lane (128) wide.
    """
    if n >= 2 * sublane or d < 2 * _LANE:
        return 1
    target = -(-2 * sublane // n)          # ceil(2*sublane / n)
    best = 1
    for r in range(2, min(d, 8 * target) + 1):
        if d % r == 0 and d // r >= _LANE:
            best = r
            if r >= target:
                break
    return best


@functools.partial(jax.jit, static_argnames=("block_bytes",))
def dice_loss(inputs, targets, block_bytes=_VMEM_BUDGET_BYTES):
    """Pallas equivalent of DiceLoss.forward(input, target)."""
    n = inputs.shape[0]
    d = 1
    for s in inputs.shape[1:]:
        d *= s

    # Sublane packing of the narrower input dtype.
    min_item = min(inputs.dtype.itemsize, targets.dtype.itemsize)
    sublane = {4: 8, 2: 16, 1: 32}.get(min_item, 8)

    # Free row-major reshape that splits each sample into R contiguous
    # pseudo-rows (fills sublanes, gives the parallel axis >= 2 blocks).
    r_split = _row_split(n, d, sublane)
    rows = n * r_split
    d_row = d // r_split

    x = inputs.reshape(rows, d_row)
    t = targets.reshape(rows, d_row)

    # Rows per block: multiple of the sublane packing, or the full row count.
    bn = rows if rows <= sublane else sublane
    n_blocks = pl.cdiv(rows, bn)

    # Tile the per-row dim so 2 inputs x 2 pipeline buffers fit the budget.
    bytes_per_col = bn * (x.dtype.itemsize + t.dtype.itemsize)
    max_cols = max(_LANE, (block_bytes // (2 * bytes_per_col)) // _LANE * _LANE)
    if d_row <= max_cols:
        tile_d = d_row          # whole row in one block (always legal)
        mask_cols = False
    else:
        tile_d = max_cols       # multiple of 128
        mask_cols = (d_row % tile_d) != 0
    d_chunks = pl.cdiv(d_row, tile_d)

    kernel = functools.partial(
        _dice_sums_kernel, d_total=d_row, tile_d=tile_d, mask_cols=mask_cols)

    out_rows = n_blocks * bn
    cost = pl.CostEstimate(
        flops=3 * rows * d_row,
        transcendentals=0,
        bytes_accessed=rows * d_row * (x.dtype.itemsize + t.dtype.itemsize)
        + 2 * out_rows * 4,
    )

    inter_sums, denom_sums = pl.pallas_call(
        kernel,
        out_shape=(
            jax.ShapeDtypeStruct((out_rows, 1), jnp.float32),
            jax.ShapeDtypeStruct((out_rows, 1), jnp.float32),
        ),
        grid_spec=pltpu.PrefetchScalarGridSpec(
            num_scalar_prefetch=0,
            grid=(n_blocks, d_chunks),
            in_specs=[
                pl.BlockSpec((bn, tile_d), lambda i, j: (i, j)),
                pl.BlockSpec((bn, tile_d), lambda i, j: (i, j)),
            ],
            out_specs=[
                # Same block across the D-chunk axis => resident accumulator.
                pl.BlockSpec((bn, 1), lambda i, j: (i, 0)),
                pl.BlockSpec((bn, 1), lambda i, j: (i, 0)),
            ],
        ),
        compiler_params=pltpu.CompilerParams(
            dimension_semantics=("parallel", "arbitrary"),
            vmem_limit_bytes=_VMEM_LIMIT_BYTES,
        ),
        cost_estimate=cost,
    )(x, t)

    # Tiny epilogue in plain JAX.  NOTE: slicing [:rows] happens BEFORE any
    # reduction so padded edge rows (rows % bn != 0) can never reach the loss.
    inter = inter_sums[:rows, 0].reshape(n, r_split).sum(axis=1)
    denom = denom_sums[:rows, 0].reshape(n, r_split).sum(axis=1)
    dice = (2.0 * inter + SMOOTH) / (denom + SMOOTH)
    return -jnp.log(jnp.sum(dice) / n)


def _dice_loss_ref(inputs, targets):
    n = inputs.shape[0]
    x = inputs.reshape(n, -1).astype(jnp.float32)
    t = targets.reshape(n, -1).astype(jnp.float32)
    inter = jnp.sum(x * t, axis=1)
    loss = (2.0 * inter + SMOOTH) / (jnp.sum(x, axis=1) + jnp.sum(t, axis=1) + SMOOTH)
    return -jnp.log(jnp.sum(loss) / n)


if __name__ == "__main__":
    key = jax.random.PRNGKey(0)
    k1, k2, k3, k4 = jax.random.split(key, 4)

    # NCHW: batch=2, channels=4, spatial=16x16 (matches the module's usage).
    inputs = jax.random.uniform(k1, (2, 4, 16, 16), dtype=jnp.float32)
    targets = (jax.random.uniform(k2, (2, 4, 16, 16)) > 0.5).astype(jnp.float32)

    loss = dice_loss(inputs, targets)
    jax.block_until_ready(loss)
    ref = _dice_loss_ref(inputs, targets)
    assert jnp.allclose(loss, ref, rtol=1e-5, atol=1e-6), (loss, ref)

    # Secondary check exercising the chunked / ragged-tail / partial-batch
    # path (D=210 not a multiple of 128, N=9 > 8) with a tiny block budget.
    inputs2 = jax.random.uniform(k3, (9, 3, 10, 7), dtype=jnp.float32)
    targets2 = (jax.random.uniform(k4, (9, 3, 10, 7)) > 0.5).astype(jnp.float32)
    loss2 = dice_loss(inputs2, targets2, block_bytes=8 * 1024)
    jax.block_until_ready(loss2)
    ref2 = _dice_loss_ref(inputs2, targets2)
    assert jnp.allclose(loss2, ref2, rtol=1e-5, atol=1e-6), (loss2, ref2)

    print("KERNEL_OK")
</pallas_src>

<mosaic_0001>
module attributes {stable_mosaic.version = 11 : i64} {
  func.func @_dice_sums_kernel(%arg0: i32, %arg1: i32, %arg2: memref<8x128xf32, #tpu.memory_space<vmem>>, %arg3: memref<8x128xf32, #tpu.memory_space<vmem>>, %arg4: memref<8x1xf32, #tpu.memory_space<vmem>>, %arg5: memref<8x1xf32, #tpu.memory_space<vmem>>) attributes {dimension_semantics = [#tpu.dimension_semantics<parallel>, #tpu.dimension_semantics<arbitrary>], iteration_bounds = array<i64: 2, 1>, scalar_prefetch = 0 : i64, scratch_operands = 0 : i64, tpu.core_type = #tpu.core_type<tc>, window_params = [{transform_indices = @transform_0, window_bounds = array<i64: 8, 128>}, {transform_indices = @transform_1, window_bounds = array<i64: 8, 128>}, {transform_indices = @transform_2, window_bounds = array<i64: 8, 1>}, {transform_indices = @transform_3, window_bounds = array<i64: 8, 1>}]} {
    %c0_i32 = arith.constant 0 : i32
    %0 = arith.cmpi eq, %arg1, %c0_i32 : i32
    %1 = arith.extui %0 : i1 to i32
    %c0_i32_0 = arith.constant 0 : i32
    %2 = arith.cmpi ne, %1, %c0_i32_0 : i32
    scf.if %2 {
      %cst_13 = arith.constant 0.000000e+00 : f32
      %17 = vector.broadcast %cst_13 : f32 to vector<8x1xf32>
      %c0_14 = arith.constant 0 : index
      %c0_15 = arith.constant 0 : index
      %18 = vector.load %arg4[%c0_14, %c0_15] : memref<8x1xf32, #tpu.memory_space<vmem>>, vector<8x1xf32>
      tpu.vector_store %arg4[%c0_14, %c0_15], %17 {strides = array<i32>} : memref<8x1xf32, #tpu.memory_space<vmem>>, vector<8x1xf32>,
      %cst_16 = arith.constant 0.000000e+00 : f32
      %19 = vector.broadcast %cst_16 : f32 to vector<8x1xf32>
      %c0_17 = arith.constant 0 : index
      %c0_18 = arith.constant 0 : index
      %20 = vector.load %arg5[%c0_17, %c0_18] : memref<8x1xf32, #tpu.memory_space<vmem>>, vector<8x1xf32>
      tpu.vector_store %arg5[%c0_17, %c0_18], %19 {strides = array<i32>} : memref<8x1xf32, #tpu.memory_space<vmem>>, vector<8x1xf32>,
    } else {
    }
    %c0 = arith.constant 0 : index
    %c0_1 = arith.constant 0 : index
    %3 = vector.load %arg2[%c0, %c0_1] : memref<8x128xf32, #tpu.memory_space<vmem>>, vector<8x128xf32>
    %c0_2 = arith.constant 0 : index
    %c0_3 = arith.constant 0 : index
    %4 = vector.load %arg3[%c0_2, %c0_3] : memref<8x128xf32, #tpu.memory_space<vmem>>, vector<8x128xf32>
    %c0_4 = arith.constant 0 : index
    %c0_5 = arith.constant 0 : index
    %5 = vector.load %arg4[%c0_4, %c0_5] : memref<8x1xf32, #tpu.memory_space<vmem>>, vector<8x1xf32>
    %6 = arith.mulf %3, %4 : vector<8x128xf32>
    %cst = arith.constant dense<0.000000e+00> : vector<8xf32>
    %7 = vector.multi_reduction <add>, %6, %cst [1] : vector<8x128xf32> to vector<8xf32>
    %8 = vector.shape_cast %7 : vector<8xf32> to vector<8x1xf32>
    %9 = arith.addf %5, %8 : vector<8x1xf32>
    %c0_6 = arith.constant 0 : index
    %c0_7 = arith.constant 0 : index
    %10 = vector.load %arg4[%c0_6, %c0_7] : memref<8x1xf32, #tpu.memory_space<vmem>>, vector<8x1xf32>
    tpu.vector_store %arg4[%c0_6, %c0_7], %9 {strides = array<i32>} : memref<8x1xf32, #tpu.memory_space<vmem>>, vector<8x1xf32>,
    %c0_8 = arith.constant 0 : index
    %c0_9 = arith.constant 0 : index
    %11 = vector.load %arg5[%c0_8, %c0_9] : memref<8x1xf32, #tpu.memory_space<vmem>>, vector<8x1xf32>
    %12 = arith.addf %3, %4 : vector<8x128xf32>
    %cst_10 = arith.constant dense<0.000000e+00> : vector<8xf32>
    %13 = vector.multi_reduction <add>, %12, %cst_10 [1] : vector<8x128xf32> to vector<8xf32>
    %14 = vector.shape_cast %13 : vector<8xf32> to vector<8x1xf32>
    %15 = arith.addf %11, %14 : vector<8x1xf32>
    %c0_11 = arith.constant 0 : index
    %c0_12 = arith.constant 0 : index
    %16 = vector.load %arg5[%c0_11, %c0_12] : memref<8x1xf32, #tpu.memory_space<vmem>>, vector<8x1xf32>
    tpu.vector_store %arg5[%c0_11, %c0_12], %15 {strides = array<i32>} : memref<8x1xf32, #tpu.memory_space<vmem>>, vector<8x1xf32>,
    return
  }
  func.func @transform_0(%arg0: i32, %arg1: i32) -> (i32, i32) {
    %c0_i32 = arith.constant 0 : i32
    return %arg0, %arg1 : i32, i32
  }
  func.func @transform_1(%arg0: i32, %arg1: i32) -> (i32, i32) {
    %c0_i32 = arith.constant 0 : i32
    return %arg0, %arg1 : i32, i32
  }
  func.func @transform_2(%arg0: i32, %arg1: i32) -> (i32, i32) {
    %c0_i32 = arith.constant 0 : i32
    %c0_i32_0 = arith.constant 0 : i32
    return %arg0, %c0_i32 : i32, i32
  }
  func.func @transform_3(%arg0: i32, %arg1: i32) -> (i32, i32) {
    %c0_i32 = arith.constant 0 : i32
    %c0_i32_0 = arith.constant 0 : i32
    return %arg0, %c0_i32 : i32, i32
  }
}

</mosaic_0001>

<bundles_post_ra>
// kernel: squeeze.3
= control target key start
LH: loop header
LB: loop body
LE: loop exit
PB: predicated region body
PF: predicated region fallthrough
CT: control target
= control target key end

     0   :  { %vm7_vm0 = vcmask 64512   ;;  %s39_s0 = inlined_call_operand.vmem [shape: f32[16], index: 0, kind: input, shape index: {}]   ;;  %s40_s1 = inlined_call_operand.vmem [shape: f32[2,8], index: 1, kind: output, shape index: {}]  }
   0x1   :  { %v4_v0 = vld [vmem:[%s39_s0] sm:$0x1]  ;;  %s22_s0 = smov 120  }
   0x2   :  { %5 = vst [vmem:[#allocation1] sm:$0x1] %v4_v0 }
   0x9   :  { %v9_v1 = vld [vmem:[#allocation1] sm:$0x1]  }
   0xa   :  { %v6_v2 = vld [vmem:[#allocation1] sm:$0x1]   ;;  %10 = vrot.lane.b32.xlu0 %v9_v1, %s22_s0 }
   0xb   :  { %8 = vst.msk [vmem:[#allocation0] sm:$0x1] %vm7_vm0, %v6_v2  }
  0x7c   :  { %v11_v3 = vpop.permute.xlu0 %10  }
  0x7d   :  { %14 = vst.msk [vmem:[#allocation0 + $0x1] sm:$0x1] %vm7_vm0, %v11_v3  }
  0x84   :  { %v18_v4 = vld [vmem:[#allocation0] sm:$0x3] }
  0x85   :  { %20 = vst [vmem:[%s40_s1] sm:$0x3] %v18_v4 }

// kernel: dice_loss.1
= control target key start
LH: loop header
LB: loop body
LE: loop exit
PB: predicated region body
PF: predicated region fallthrough
CT: control target
= control target key end

     0   :  { %s441_s12 = smov 0   ;;  %s443_s13 = smov 0   ;;  %s484_s0 = inlined_call_operand.vmem [shape: f32[16,128], index: 0, kind: input, shape index: {}]   ;;  %s485_s1 = inlined_call_operand.vmem [shape: f32[16,128], index: 1, kind: input, shape index: {}]   ;;  %s486_s2 = inlined_call_operand.vmem [shape: f32[16,1], index: 2, kind: output, shape index: {0}]   ;;  %s487_s3 = inlined_call_operand.vmem [shape: f32[16,1], index: 3, kind: output, shape index: {1}]  }
   0x1   :  { %s445_s14 = smov 0  }
   0x2 LB: > { %s26_s15 = sadd.s32 1, %s414_s13  ;;  %p364_p0 = scmp.ge.s32.totalorder %s418_s14, 1  ;;  %s418_s14 = sphi %s445_s14, %s14_s14   ;;  %s414_s13 = sphi %s443_s13, %s489_s13   ;;  %s410_s12 = sphi %s441_s12, %s488_s12  }
   0x3   : > { %p28_p1 = scmp.ge.s32.totalorder %s26_s15, 2  ;;  %p170_p2 = scmp.lt.s32.totalorder %s418_s14, 3 }
   0x5   : > { %s491_s15 = smov (%p28_p1, %s26_s15), 0  ;;  %p171_p3 = pnand %p364_p0, %p170_p2 }
   0x6   : > { %p206_p4 = scmp.lt.s32.totalorder (!%p171_p3), %s410_s12, 1  ;;  %vm232_vm0 = vcmask (!%p171_p3), 7168   ;;  %v420_v3 = vmov (!%p171_p3), 0.0  }
   0x7   : > { %174 = sbr.rel (%p171_p3) target bundleno = 170 (0xaa), region = 28 }
   0xe   : > { %s493_s12 = smov (!%p206_p4, %s410_s12), 1 }
   0xf   : > { %s365_s16 = sshll.u32 %s493_s12, 3 }
  0x10   : > { %s212_s19 = scalar_lea.vmem %s484_s0, %s365_s16  ;;  %s219_s22 = scalar_lea.vmem %s485_s1, %s365_s16 }
  0x11   : > { %v235_v0 = vld [vmem:[%s212_s19] sm:$0xff]  ;;  %s223_s25 = scalar_lea.vmem %s486_s2, %s365_s16  ;;  %s227_s28 = scalar_lea.vmem %s487_s3, %s365_s16 }
  0x12   : > { %v236_v1 = vld [vmem:[%s219_s22] sm:$0xff]  ;;  %233 = vst.msk [vmem:[%s223_s25] sm:$0xff] %vm232_vm0, %v420_v3  ;;  %234 = vst.msk [vmem:[%s227_s28] sm:$0xff] %vm232_vm0, %v420_v3 }
  0x13   : > { %v238_v2 = vmul.f32 %v236_v1, %v235_v0  ;;  %v245_v4 = vadd.f32 %v236_v1, %v235_v0 }
  0x15   : > { %239 = vadd.xlane.f32.xlu0 %v238_v2 }
  0x19   : > { %246 = vadd.xlane.f32.xlu0 %v245_v4  ;;  %v237_v5 = vld [vmem:[%s223_s25] sm:$0xff] }
  0x1a   : > { %v244_v8 = vld [vmem:[%s227_s28] sm:$0xff] }
  0xa2   : > { %v240_v6 = vpop.xlane.xlu0 %239 }
  0xa3   : > { %v241_v7 = vadd.f32 %v240_v6, %v237_v5 }
  0xa5   : > { %243 = vst.msk [vmem:[%s223_s25] sm:$0xff] %vm232_vm0, %v241_v7 }
  0xa6   : > { %v247_v9 = vpop.xlane.xlu0 %246 }
  0xa7   : > { %v248_v10 = vadd.f32 %v247_v9, %v244_v8 }
  0xa9   : > { %249 = vst.msk [vmem:[%s227_s28] sm:$0xff] %vm232_vm0, %v248_v10 }
  0xaa PF: > { %s14_s14 = sadd.s32 1, %s418_s14   ;;  %s488_s12 = smov %s414_s13 }
  0xab   : > { %p11_p5 = scmp.ge.s32.totalorder %s14_s14, 4   ;;  %s489_s13 = smov %s491_s15 }
  0xad   :  { %13 = sbr.rel (!%p11_p5) target bundleno = 2 (0x2), region = 77 }

</bundles_post_ra>
